<compile_context>
chip_gen: v7x
topology: tpu7x:2x2x1
jax: 0.10.0
libtpu: 0.0.40
codegen_flags: <defaults>
</compile_context>

<pallas_src>
from functools import partial

import jax
import jax.numpy as jnp
from jax.experimental import pallas as pl
from jax.experimental.pallas import tpu as pltpu

HIDDEN = 128
LANE = 128
MAX_TILE = 1024        # cap on batch-tile rows
TWO_TILE_MIN_B = 64    # batches at least this large get >= 2 tiles (v7x megacore)


def _round_up(x: int, m: int) -> int:
    return ((x + m - 1) // m) * m


def dqn_kernel(x_ref, w1_ref, b1_ref, w2_ref, b2_ref, w3_ref, b3_ref, o_ref):
    """Fused MLP forward for one batch tile: relu(xW1+b1) -> relu(.W2+b2) -> .W3+b3."""
    h1 = jnp.dot(x_ref[...], w1_ref[...], preferred_element_type=jnp.float32) + b1_ref[...]
    h1 = jnp.maximum(h1, 0.0)
    h2 = jnp.dot(h1, w2_ref[...], preferred_element_type=jnp.float32) + b2_ref[...]
    h2 = jnp.maximum(h2, 0.0)
    o_ref[...] = jnp.dot(h2, w3_ref[...], preferred_element_type=jnp.float32) + b3_ref[...]


@partial(jax.jit, static_argnums=(2,))
def dqn_forward(x, params, n_actions):
    """x: [B, n_observations] f32; params hold lane-padded W3/b3. Returns [B, n_actions] f32."""
    w1, b1, w2, b2, w3p, b3p = params
    B, n_obs = x.shape
    n_out_pad = w3p.shape[1]   # already a multiple of 128 (padded once at init)

    # Batch tiling (see header). tm never exceeds B; ragged trailing block is masked by Pallas.
    if B < TWO_TILE_MIN_B:
        tm = B
    else:
        tm = min(MAX_TILE, _round_up(pl.cdiv(B, 2), 8))
    grid = (pl.cdiv(B, tm),)

    flops = 2 * B * (n_obs * HIDDEN + HIDDEN * HIDDEN + HIDDEN * n_out_pad)
    bytes_accessed = 4 * (
        B * n_obs + B * n_out_pad
        + n_obs * HIDDEN + HIDDEN
        + HIDDEN * HIDDEN + HIDDEN
        + HIDDEN * n_out_pad + n_out_pad
    )

    out = pl.pallas_call(
        dqn_kernel,
        out_shape=jax.ShapeDtypeStruct((B, n_out_pad), jnp.float32),
        grid_spec=pltpu.PrefetchScalarGridSpec(
            num_scalar_prefetch=0,
            grid=grid,
            in_specs=[
                pl.BlockSpec((tm, n_obs), lambda i: (i, 0)),           # x tile
                pl.BlockSpec((n_obs, HIDDEN), lambda i: (0, 0)),       # W1 (VMEM-resident)
                pl.BlockSpec((1, HIDDEN), lambda i: (0, 0)),           # b1
                pl.BlockSpec((HIDDEN, HIDDEN), lambda i: (0, 0)),      # W2
                pl.BlockSpec((1, HIDDEN), lambda i: (0, 0)),           # b2
                pl.BlockSpec((HIDDEN, n_out_pad), lambda i: (0, 0)),   # W3 (lane-padded)
                pl.BlockSpec((1, n_out_pad), lambda i: (0, 0)),        # b3 (lane-padded)
            ],
            out_specs=pl.BlockSpec((tm, n_out_pad), lambda i: (i, 0)),
        ),
        compiler_params=pltpu.CompilerParams(
            dimension_semantics=("parallel",),
        ),
        cost_estimate=pl.CostEstimate(
            flops=flops, transcendentals=0, bytes_accessed=bytes_accessed),
    )(x, w1, b1, w2, b2, w3p, b3p)

    # Thin column slice back to the module's [B, n_actions] contract.
    # TODO(synk): fuse argmax / taken-action gather into the kernel when the consumer allows it.
    return out[:, :n_actions]


def init_params(key, n_observations, n_actions):
    """Deterministic init mimicking nn.Linear's U(-1/sqrt(fan_in), 1/sqrt(fan_in)).

    The final layer's weight/bias are zero-padded to a lane-dense (multiple of 128) output
    width ONCE here, so the forward pass launches no per-call pad ops.
    """
    ks = jax.random.split(key, 6)

    def linear(kw, kb, fan_in, fan_out):
        bound = 1.0 / float(fan_in) ** 0.5
        w = jax.random.uniform(kw, (fan_in, fan_out), jnp.float32, -bound, bound)
        b = jax.random.uniform(kb, (1, fan_out), jnp.float32, -bound, bound)
        return w, b

    w1, b1 = linear(ks[0], ks[1], n_observations, HIDDEN)
    w2, b2 = linear(ks[2], ks[3], HIDDEN, HIDDEN)
    w3, b3 = linear(ks[4], ks[5], HIDDEN, n_actions)

    n_out_pad = _round_up(n_actions, LANE)
    if n_out_pad != n_actions:
        w3 = jnp.pad(w3, ((0, 0), (0, n_out_pad - n_actions)))
        b3 = jnp.pad(b3, ((0, 0), (0, n_out_pad - n_actions)))
    return (w1, b1, w2, b2, w3, b3)


def dqn_reference(x, params, n_actions):
    w1, b1, w2, b2, w3p, b3p = params
    h1 = jnp.maximum(x @ w1 + b1, 0.0)
    h2 = jnp.maximum(h1 @ w2 + b2, 0.0)
    return (h2 @ w3p + b3p)[:, :n_actions]


if __name__ == "__main__":
    n_observations = 4   # e.g. CartPole observation dim
    n_actions = 2        # e.g. CartPole action dim

    key = jax.random.PRNGKey(0)
    k_x, k_p, k_x2 = jax.random.split(key, 3)
    params = init_params(k_p, n_observations, n_actions)

    # Small-batch path (single tile, grid=(1,), no padding of x).
    batch = 2
    x = jax.random.normal(k_x, (batch, n_observations), jnp.float32)
    out = dqn_forward(x, params, n_actions)
    jax.block_until_ready(out)
    ref = dqn_reference(x, params, n_actions)
    assert out.shape == (batch, n_actions)
    assert jnp.allclose(out, ref, atol=1e-5, rtol=1e-5), "mismatch vs reference (small batch)"

    # Larger-batch path (2 tiles, ragged trailing block masked by Pallas, no x padding).
    batch2 = 300
    x2 = jax.random.normal(k_x2, (batch2, n_observations), jnp.float32)
    out2 = dqn_forward(x2, params, n_actions)
    jax.block_until_ready(out2)
    ref2 = dqn_reference(x2, params, n_actions)
    assert out2.shape == (batch2, n_actions)
    assert jnp.allclose(out2, ref2, atol=1e-5, rtol=1e-5), "mismatch vs reference (large batch)"

    print("KERNEL_OK")
</pallas_src>

<mosaic_0001>
module attributes {stable_mosaic.version = 11 : i64} {
  func.func @dqn_kernel(%arg0: i32, %arg1: memref<2x4xf32, #tpu.memory_space<vmem>>, %arg2: memref<4x128xf32, #tpu.memory_space<vmem>>, %arg3: memref<1x128xf32, #tpu.memory_space<vmem>>, %arg4: memref<128x128xf32, #tpu.memory_space<vmem>>, %arg5: memref<1x128xf32, #tpu.memory_space<vmem>>, %arg6: memref<128x128xf32, #tpu.memory_space<vmem>>, %arg7: memref<1x128xf32, #tpu.memory_space<vmem>>, %arg8: memref<2x128xf32, #tpu.memory_space<vmem>>) attributes {dimension_semantics = [#tpu.dimension_semantics<parallel>], iteration_bounds = array<i64: 1>, scalar_prefetch = 0 : i64, scratch_operands = 0 : i64, tpu.core_type = #tpu.core_type<tc>, window_params = [{transform_indices = @transform_0, window_bounds = array<i64: 2, 4>}, {pipeline_mode = #tpu.pipeline_mode<synchronous>, transform_indices = @transform_1, window_bounds = array<i64: 4, 128>}, {pipeline_mode = #tpu.pipeline_mode<synchronous>, transform_indices = @transform_2, window_bounds = array<i64: 1, 128>}, {pipeline_mode = #tpu.pipeline_mode<synchronous>, transform_indices = @transform_3, window_bounds = array<i64: 128, 128>}, {pipeline_mode = #tpu.pipeline_mode<synchronous>, transform_indices = @transform_4, window_bounds = array<i64: 1, 128>}, {pipeline_mode = #tpu.pipeline_mode<synchronous>, transform_indices = @transform_5, window_bounds = array<i64: 128, 128>}, {pipeline_mode = #tpu.pipeline_mode<synchronous>, transform_indices = @transform_6, window_bounds = array<i64: 1, 128>}, {transform_indices = @transform_7, window_bounds = array<i64: 2, 128>}]} {
    %c0 = arith.constant 0 : index
    %c0_0 = arith.constant 0 : index
    %0 = vector.load %arg1[%c0, %c0_0] : memref<2x4xf32, #tpu.memory_space<vmem>>, vector<2x4xf32>
    %c0_1 = arith.constant 0 : index
    %c0_2 = arith.constant 0 : index
    %1 = vector.load %arg2[%c0_1, %c0_2] : memref<4x128xf32, #tpu.memory_space<vmem>>, vector<4x128xf32>
    %cst = arith.constant dense<0.000000e+00> : vector<2x128xf32>
    %2 = tpu.matmul %0, %1, %cst {dimension_numbers = #tpu.dot_dimension_numbers<[1], [0], [0], [1], [0, 0, 1, 1], [], []>} : vector<2x4xf32>, vector<4x128xf32>, vector<2x128xf32> -> vector<2x128xf32>
    %c0_3 = arith.constant 0 : index
    %c0_4 = arith.constant 0 : index
    %3 = vector.load %arg3[%c0_3, %c0_4] : memref<1x128xf32, #tpu.memory_space<vmem>>, vector<1x128xf32>
    %4 = vector.broadcast %3 : vector<1x128xf32> to vector<2x128xf32>
    %5 = arith.addf %2, %4 : vector<2x128xf32>
    %cst_5 = arith.constant 0.000000e+00 : f32
    %6 = vector.broadcast %cst_5 : f32 to vector<2x128xf32>
    %7 = arith.maximumf %5, %6 : vector<2x128xf32>
    %c0_6 = arith.constant 0 : index
    %c0_7 = arith.constant 0 : index
    %8 = vector.load %arg4[%c0_6, %c0_7] : memref<128x128xf32, #tpu.memory_space<vmem>>, vector<128x128xf32>
    %cst_8 = arith.constant dense<0.000000e+00> : vector<2x128xf32>
    %9 = tpu.matmul %7, %8, %cst_8 {dimension_numbers = #tpu.dot_dimension_numbers<[1], [0], [0], [1], [0, 0, 1, 1], [], []>} : vector<2x128xf32>, vector<128x128xf32>, vector<2x128xf32> -> vector<2x128xf32>
    %c0_9 = arith.constant 0 : index
    %c0_10 = arith.constant 0 : index
    %10 = vector.load %arg5[%c0_9, %c0_10] : memref<1x128xf32, #tpu.memory_space<vmem>>, vector<1x128xf32>
    %11 = vector.broadcast %10 : vector<1x128xf32> to vector<2x128xf32>
    %12 = arith.addf %9, %11 : vector<2x128xf32>
    %cst_11 = arith.constant 0.000000e+00 : f32
    %13 = vector.broadcast %cst_11 : f32 to vector<2x128xf32>
    %14 = arith.maximumf %12, %13 : vector<2x128xf32>
    %c0_12 = arith.constant 0 : index
    %c0_13 = arith.constant 0 : index
    %15 = vector.load %arg6[%c0_12, %c0_13] : memref<128x128xf32, #tpu.memory_space<vmem>>, vector<128x128xf32>
    %cst_14 = arith.constant dense<0.000000e+00> : vector<2x128xf32>
    %16 = tpu.matmul %14, %15, %cst_14 {dimension_numbers = #tpu.dot_dimension_numbers<[1], [0], [0], [1], [0, 0, 1, 1], [], []>} : vector<2x128xf32>, vector<128x128xf32>, vector<2x128xf32> -> vector<2x128xf32>
    %c0_15 = arith.constant 0 : index
    %c0_16 = arith.constant 0 : index
    %17 = vector.load %arg7[%c0_15, %c0_16] : memref<1x128xf32, #tpu.memory_space<vmem>>, vector<1x128xf32>
    %18 = vector.broadcast %17 : vector<1x128xf32> to vector<2x128xf32>
    %19 = arith.addf %16, %18 : vector<2x128xf32>
    %c0_17 = arith.constant 0 : index
    %c0_18 = arith.constant 0 : index
    %20 = vector.load %arg8[%c0_17, %c0_18] : memref<2x128xf32, #tpu.memory_space<vmem>>, vector<2x128xf32>
    tpu.vector_store %arg8[%c0_17, %c0_18], %19 {strides = array<i32>} : memref<2x128xf32, #tpu.memory_space<vmem>>, vector<2x128xf32>,
    return
  }
  func.func @transform_0(%arg0: i32) -> (i32, i32) {
    %c0_i32 = arith.constant 0 : i32
    %c0_i32_0 = arith.constant 0 : i32
    return %arg0, %c0_i32 : i32, i32
  }
  func.func @transform_1(%arg0: i32) -> (i32, i32) {
    %c0_i32 = arith.constant 0 : i32
    %c0_i32_0 = arith.constant 0 : i32
    %c0_i32_1 = arith.constant 0 : i32
    return %c0_i32, %c0_i32_0 : i32, i32
  }
  func.func @transform_2(%arg0: i32) -> (i32, i32) {
    %c0_i32 = arith.constant 0 : i32
    %c0_i32_0 = arith.constant 0 : i32
    %c0_i32_1 = arith.constant 0 : i32
    return %c0_i32, %c0_i32_0 : i32, i32
  }
  func.func @transform_3(%arg0: i32) -> (i32, i32) {
    %c0_i32 = arith.constant 0 : i32
    %c0_i32_0 = arith.constant 0 : i32
    %c0_i32_1 = arith.constant 0 : i32
    return %c0_i32, %c0_i32_0 : i32, i32
  }
  func.func @transform_4(%arg0: i32) -> (i32, i32) {
    %c0_i32 = arith.constant 0 : i32
    %c0_i32_0 = arith.constant 0 : i32
    %c0_i32_1 = arith.constant 0 : i32
    return %c0_i32, %c0_i32_0 : i32, i32
  }
  func.func @transform_5(%arg0: i32) -> (i32, i32) {
    %c0_i32 = arith.constant 0 : i32
    %c0_i32_0 = arith.constant 0 : i32
    %c0_i32_1 = arith.constant 0 : i32
    return %c0_i32, %c0_i32_0 : i32, i32
  }
  func.func @transform_6(%arg0: i32) -> (i32, i32) {
    %c0_i32 = arith.constant 0 : i32
    %c0_i32_0 = arith.constant 0 : i32
    %c0_i32_1 = arith.constant 0 : i32
    return %c0_i32, %c0_i32_0 : i32, i32
  }
  func.func @transform_7(%arg0: i32) -> (i32, i32) {
    %c0_i32 = arith.constant 0 : i32
    %c0_i32_0 = arith.constant 0 : i32
    return %arg0, %c0_i32 : i32, i32
  }
}

</mosaic_0001>

<bundles_post_ra>
// kernel: dqn_forward.1
= control target key start
LH: loop header
LB: loop body
LE: loop exit
PB: predicated region body
PF: predicated region fallthrough
CT: control target
= control target key end

     0   :  { %12 = vsyncpa [#allocation3], 0  ;;  %s801_s0 = inlined_call_operand.hbm [shape: f32[2,4], index: 0, kind: input, shape index: {}]   ;;  %s802_s1 = inlined_call_operand.hbm [shape: f32[4,128], index: 1, kind: input, shape index: {}]   ;;  %s803_s2 = inlined_call_operand.vmem [shape: f32[1,128], index: 2, kind: input, shape index: {}]   ;;  %s804_s3 = inlined_call_operand.hbm [shape: f32[128,128], index: 3, kind: input, shape index: {}]   ;;  %s805_s4 = inlined_call_operand.vmem [shape: f32[1,128], index: 4, kind: input, shape index: {}]   ;;  %s806_s5 = inlined_call_operand.hbm [shape: f32[128,128], index: 5, kind: input, shape index: {}]   ;;  %s807_s6 = inlined_call_operand.vmem [shape: f32[1,128], index: 6, kind: input, shape index: {}]   ;;  %s808_s7 = inlined_call_operand.hbm [shape: f32[2,128], index: 7, kind: output, shape index: {}]  }
   0x1   :  { %13 = vsyncpa [#allocation6], 0 }
   0x2   :  { %14 = vsyncpa [#allocation9], 0 }
   0x3   :  { %15 = vsyncpa [#allocation4], 0  ;;  %s663_s24 = smov [#allocation5]   ;;  %s664_s26 = smov [#allocation2]  }
   0x4   :  { %s32_s25 = sshll.u32 %s663_s24, 4  ;;  %s22_s27 = sshll.u32 %s664_s26, 4  ;;  %s33_s25 = int_to_ptr.vmem [resolvable:$true] %s32_s25  ;;  %s23_s27 = int_to_ptr.vmem [resolvable:$true] %s22_s27 }
   0x5   :  { %s545_s30 = scalar_lea.hbm %s802_s1, 64 }
   0x6   :  { %p546_p0 = scmp.ne.s32.totalorder %s802_s1, %s545_s30  ;;  %p549_p1 = scmp.lt.u32.totalorder %s545_s30, %s802_s1 }
   0x8   :  { %p551_p2 = pnand %p549_p1, %p546_p0 }
   0xa   :  { %554 = shalt.err (!%p551_p2)
}
   0xb   :  { %s555_s12 = scalar_lea.vmem %s33_s25, 64  ;;  %p560_p4 = scmp.lt.s32.totalorder %s33_s25, %s33_s25 }
   0xc   :  { %p556_p3 = scmp.ne.s32.totalorder %s33_s25, %s555_s12  ;;  %p561_p5 = scmp.lt.s32.totalorder %s555_s12, %s555_s12 }
   0xe   :  { %p562_p6 = por %p561_p5, %p560_p4 }
  0x10   :  { %p563_p7 = pnand %p562_p6, %p556_p3 }
  0x12   :  { %566 = shalt.err (!%p563_p7)
}
  0x13   :  { %35 = dma.hbm_to_vmem [thread:$0]  %s802_s1, 64, %s33_s25, [#allocation6]  }
  0x14   :  { %s567_s17 = scalar_lea.hbm %s801_s0, 32 }
  0x15   :  { %p568_p8 = scmp.ne.s32.totalorder %s801_s0, %s567_s17  ;;  %p571_p9 = scmp.lt.u32.totalorder %s567_s17, %s801_s0 }
  0x17   :  { %p573_p10 = pnand %p571_p9, %p568_p8 }
  0x19   :  { %576 = shalt.err (!%p573_p10)
}
  0x1a   :  { %s577_s22 = scalar_lea.vmem %s23_s27, 32  ;;  %p582_p12 = scmp.lt.s32.totalorder %s23_s27, %s23_s27 }
  0x1b   :  { %p578_p11 = scmp.ne.s32.totalorder %s23_s27, %s577_s22  ;;  %p583_p13 = scmp.lt.s32.totalorder %s577_s22, %s577_s22 }
  0x1d   :  { %p584_p0 = por %p583_p13, %p582_p12 }
  0x1f   :  { %p585_p1 = pnand %p584_p0, %p578_p11 }
  0x21   :  { %588 = shalt.err (!%p585_p1)
}
  0x22   :  { %25 = dma.hbm_to_vmem [thread:$0]  %s801_s0, 32, %s23_s27, [#allocation3]  }
  0x23   :  { %s665_s24 = smov [#allocation7]   ;;  %s589_s29 = scalar_lea.hbm %s804_s3, 2048 }
  0x24   :  { %s43_s25 = sshll.u32 %s665_s24, 4  ;;  %p590_p2 = scmp.ne.s32.totalorder %s804_s3, %s589_s29  ;;  %s44_s25 = int_to_ptr.vmem [resolvable:$true] %s43_s25 }
  0x25   :  { %p593_p3 = scmp.lt.u32.totalorder %s589_s29, %s804_s3 }
  0x27   :  { %p595_p4 = pnand %p593_p3, %p590_p2 }
  0x29   :  { %598 = shalt.err (!%p595_p4)
}
  0x2a   :  { %s599_s11 = scalar_lea.vmem %s44_s25, 2048  ;;  %p604_p6 = scmp.lt.s32.totalorder %s44_s25, %s44_s25 }
  0x2b   :  { %p600_p5 = scmp.ne.s32.totalorder %s44_s25, %s599_s11  ;;  %p605_p7 = scmp.lt.s32.totalorder %s599_s11, %s599_s11 }
  0x2d   :  { %p606_p8 = por %p605_p7, %p604_p6 }
  0x2f   :  { %p607_p9 = pnand %p606_p8, %p600_p5 }
  0x31   :  { %610 = shalt.err (!%p607_p9)
}
  0x32   :  { %s666_s0 = smov 128   ;;  %s667_s27 = smov 8  }
  0x33   :  { %49 = dma.hbm_to_vmem [thread:$0]  %s804_s3, 2048, %s44_s25, [#allocation6], %s666_s0, %s666_s0, %s667_s27  }
  0x34   :  { %s668_s14 = smov [#allocation8]   ;;  %s611_s18 = scalar_lea.hbm %s806_s5, 2048 }
  0x35   :  { %s57_s15 = sshll.u32 %s668_s14, 4  ;;  %p612_p10 = scmp.ne.s32.totalorder %s806_s5, %s611_s18  ;;  %s58_s15 = int_to_ptr.vmem [resolvable:$true] %s57_s15 }
  0x36   :  { %p615_p11 = scmp.lt.u32.totalorder %s611_s18, %s806_s5 }
  0x38   :  { %p617_p12 = pnand %p615_p11, %p612_p10 }
  0x3a   :  { %620 = shalt.err (!%p617_p12)
}
  0x3b   :  { %s621_s1 = scalar_lea.vmem %s58_s15, 2048  ;;  %p626_p0 = scmp.lt.s32.totalorder %s58_s15, %s58_s15 }
  0x3c   :  { %p622_p13 = scmp.ne.s32.totalorder %s58_s15, %s621_s1  ;;  %p627_p1 = scmp.lt.s32.totalorder %s621_s1, %s621_s1 }
  0x3e   :  { %p628_p2 = por %p627_p1, %p626_p0 }
  0x40   :  { %p629_p3 = pnand %p628_p2, %p622_p13 }
  0x42   :  { %632 = shalt.err (!%p629_p3)
}
  0x43   :  { %63 = dma.hbm_to_vmem [thread:$0]  %s806_s5, 2048, %s58_s15, [#allocation9], %s666_s0, %s666_s0, %s667_s27  }
  0x44   :  { %655 = dma.done.wait [#allocation3], 32  }
  0x45   :  { %656 = vsyncadd [#allocation3], 4294967264 }
  0x46   :  { %657 = dma.done.wait [#allocation6], 2112  }
  0x47   :  { %658 = vsyncadd [#allocation6], 4294965184 }
  0x48   :  { %659 = dma.done.wait [#allocation9], 2048  }
  0x49   :  { %660 = vsyncadd [#allocation9], 4294965248  ;;  %v669_v0 = vmov 0.0   ;;  %vm670_vm0 = vmmov 0   ;;  %v671_v1 = vmov 0.0|0.0   ;;  %vm91_vm1 = vcmask 1043456  }
  0x4a   :  { %412 = vmatprep.subr.mxu0 %v669_v0  ;;  %414 = vmatprep.mubr.msk.f32.mxu0 %vm670_vm0, %v669_v0  ;;  %vm87_vm2 = vcmask 31744   ;;  %v79_v2 = vld [vmem:[#allocation5] sm:$0xf]  ;;  %v78_v3 = vld [vmem:[#allocation2] sm:$0x3]  ;;  %v166_v4 = vld [vmem:[#allocation7] sm:$0xff] }
  0x4b   :  { %487 = vmatprep.subr.bf16.mxu1 %v671_v1  ;;  %449 = vmatprep.mubr.msk.f32.mxu1 %vm670_vm0, %v669_v0  ;;  %v167_v5 = vld [vmem:[#allocation7 + $0x8] sm:$0xff]  ;;  %v168_v6 = vld [vmem:[#allocation7 + $0x10] sm:$0xff]  ;;  %v169_v7 = vld [vmem:[#allocation7 + $0x18] sm:$0xff]  ;;  %s672_s29 = smov [#allocation10]  }
  0x4c   :  { %413 = vmatpush3.msk.msra.mxu0 %vm91_vm1, %v79_v2  ;;  %v488_v8 = vpack.c.bf16 %v167_v5, %v166_v4  ;;  %v491_v9 = vpack.c.bf16 %v169_v7, %v168_v6  ;;  %v170_v10 = vld [vmem:[#allocation7 + $0x20] sm:$0xff]  ;;  %v171_v11 = vld [vmem:[#allocation7 + $0x28] sm:$0xff]  ;;  %v172_v13 = vld [vmem:[#allocation7 + $0x30] sm:$0xff]  ;;  %s360_s30 = sshll.u32 %s672_s29, 4  ;;  %s361_s30 = int_to_ptr.vmem [resolvable:$true] %s360_s30 }
  0x4d   :  { %415 = vmatmul.mubr.msk.f32.vlgmr.msra.gmra.mrb[0].mxu0 %vm87_vm2, %v78_v3  ;;  %511 = vmatprep.subr.bf16.mxu0 %v671_v1  ;;  %v494_v12 = vpack.c.bf16 %v171_v11, %v170_v10  ;;  %v173_v14 = vld [vmem:[#allocation7 + $0x38] sm:$0xff]  ;;  %v174_v16 = vld [vmem:[#allocation7 + $0x40] sm:$0xff]  ;;  %v175_v17 = vld [vmem:[#allocation7 + $0x48] sm:$0xff]  ;;  %s633_s8 = scalar_lea.vmem %s361_s30, 32  ;;  %p638_p5 = scmp.lt.s32.totalorder %s361_s30, %s361_s30 }
  0x4e   :  { %484 = vmatprep.mubr.msk.f32.mxu0 %vm670_vm0, %v669_v0  ;;  %489 = vmatpush3.bf16.msra.mxu1 %v488_v8  ;;  %v497_v15 = vpack.c.bf16 %v173_v14, %v172_v13  ;;  %v500_v18 = vpack.c.bf16 %v175_v17, %v174_v16  ;;  %v176_v19 = vld [vmem:[#allocation7 + $0x50] sm:$0xff]  ;;  %v177_v20 = vld [vmem:[#allocation7 + $0x58] sm:$0xff]  ;;  %v178_v22 = vld [vmem:[#allocation7 + $0x60] sm:$0xff]  ;;  %p634_p4 = scmp.ne.s32.totalorder %s361_s30, %s633_s8  ;;  %p639_p6 = scmp.lt.s32.totalorder %s633_s8, %s633_s8 }
  0x4f   :  { %490 = vmatprep.subr.bf16.mxu1 %v671_v1  ;;  %v503_v21 = vpack.c.bf16 %v177_v20, %v176_v19  ;;  %v179_v23 = vld [vmem:[#allocation7 + $0x68] sm:$0xff]  ;;  %v180_v25 = vld [vmem:[#allocation7 + $0x70] sm:$0xff]  ;;  %v181_v26 = vld [vmem:[#allocation7 + $0x78] sm:$0xff] }
  0x50   :  { %v506_v24 = vpack.c.bf16 %v179_v23, %v178_v22  ;;  %v509_v27 = vpack.c.bf16 %v181_v26, %v180_v25  ;;  %v260_v28 = vld [vmem:[#allocation8] sm:$0xff]  ;;  %v261_v29 = vld [vmem:[#allocation8 + $0x8] sm:$0xff]  ;;  %v262_v30 = vld [vmem:[#allocation8 + $0x10] sm:$0xff]  ;;  %p640_p7 = por %p639_p6, %p638_p5 }
  0x51   :  { %v512_v31 = vpack.c.bf16 %v261_v29, %v260_v28  ;;  %v263_v32 = vld [vmem:[#allocation8 + $0x18] sm:$0xff]  ;;  %v264_v34 = vld [vmem:[#allocation8 + $0x20] sm:$0xff]  ;;  %v265_v35 = vld [vmem:[#allocation8 + $0x28] sm:$0xff] }
  0x52   :  { %492 = vmatpush3.bf16.msra.mxu1 %v491_v9  ;;  %v515_v33 = vpack.c.bf16 %v263_v32, %v262_v30  ;;  %v518_v36 = vpack.c.bf16 %v265_v35, %v264_v34  ;;  %v266_v37 = vld [vmem:[#allocation8 + $0x30] sm:$0xff]  ;;  %v267_v38 = vld [vmem:[#allocation8 + $0x38] sm:$0xff]  ;;  %v268_v40 = vld [vmem:[#allocation8 + $0x40] sm:$0xff]  ;;  %p641_p8 = pnand %p640_p7, %p634_p4 }
  0x53   :  { %493 = vmatprep.subr.bf16.mxu1 %v671_v1  ;;  %513 = vmatpush3.bf16.msra.mxu0 %v512_v31  ;;  %v521_v39 = vpack.c.bf16 %v267_v38, %v266_v37  ;;  %v269_v41 = vld [vmem:[#allocation8 + $0x48] sm:$0xff]  ;;  %v270_v43 = vld [vmem:[#allocation8 + $0x50] sm:$0xff]  ;;  %v271_v44 = vld [vmem:[#allocation8 + $0x58] sm:$0xff] }
  0x54   :  { %514 = vmatprep.subr.bf16.mxu0 %v671_v1  ;;  %v524_v42 = vpack.c.bf16 %v269_v41, %v268_v40  ;;  %v527_v45 = vpack.c.bf16 %v271_v44, %v270_v43  ;;  %v272_v46 = vld [vmem:[#allocation8 + $0x60] sm:$0xff]  ;;  %v273_v47 = vld [vmem:[#allocation8 + $0x68] sm:$0xff]  ;;  %v371_v49 = vld [vmem:[%s803_s2] ss:$0 sm:$0xff] }
  0x55   :  { %v530_v48 = vpack.c.bf16 %v273_v47, %v272_v46  ;;  %v274_v54 = vld [vmem:[#allocation8 + $0x70] sm:$0xff]  ;;  %v275_v55 = vld [vmem:[#allocation8 + $0x78] sm:$0xff] }
  0x56   :  { %495 = vmatpush3.bf16.msra.mxu1 %v494_v12  ;;  %v533_v56 = vpack.c.bf16 %v275_v55, %v274_v54  ;;  %v374_v57 = vld [vmem:[%s805_s4] ss:$0 sm:$0xff] }
  0x57   :  { %496 = vmatprep.subr.bf16.mxu1 %v671_v1  ;;  %516 = vmatpush3.bf16.msra.mxu0 %v515_v33  ;;  %v375_v62 = vld [vmem:[%s807_s6] ss:$0 sm:$0xff] }
  0x58   :  { %517 = vmatprep.subr.bf16.mxu0 %v671_v1 }
  0x5a   :  { %498 = vmatpush3.bf16.msra.mxu1 %v497_v15 }
  0x5b   :  { %499 = vmatprep.subr.bf16.mxu1 %v671_v1  ;;  %519 = vmatpush3.bf16.msra.mxu0 %v518_v36 }
  0x5c   :  { %520 = vmatprep.subr.bf16.mxu0 %v671_v1 }
  0x5e   :  { %501 = vmatpush3.bf16.msra.mxu1 %v500_v18 }
  0x5f   :  { %502 = vmatprep.subr.bf16.mxu1 %v671_v1  ;;  %522 = vmatpush3.bf16.msra.mxu0 %v521_v39 }
  0x60   :  { %523 = vmatprep.subr.bf16.mxu0 %v671_v1 }
  0x62   :  { %504 = vmatpush3.bf16.msra.mxu1 %v503_v21 }
  0x63   :  { %505 = vmatprep.subr.bf16.mxu1 %v671_v1  ;;  %525 = vmatpush3.bf16.msra.mxu0 %v524_v42 }
  0x64   :  { %526 = vmatprep.subr.bf16.mxu0 %v671_v1 }
  0x66   :  { %507 = vmatpush3.bf16.msra.mxu1 %v506_v24 }
  0x67   :  { %508 = vmatprep.subr.bf16.mxu1 %v671_v1  ;;  %528 = vmatpush3.bf16.msra.mxu0 %v527_v45 }
  0x68   :  { %529 = vmatprep.subr.bf16.mxu0 %v671_v1 }
  0x6a   :  { %510 = vmatpush3.bf16.msra.mxu1 %v509_v27 }
  0x6b   :  { %531 = vmatpush3.bf16.msra.mxu0 %v530_v48 }
  0x6c   :  { %532 = vmatprep.subr.bf16.mxu0 %v671_v1 }
  0x6f   :  { %534 = vmatpush3.bf16.msra.mxu0 %v533_v56 }
 0x120   :  { %v161_v50 = vpop.f32.mrb[0].mxu0 }
 0x121   :  { %v162_v51 = vadd.f32 %v371_v49, %v161_v50  ;;  %v416_v52 = vpop.f32.mrb[1].mxu0 }
 0x123   :  { %v165_v53 = vmax.f32 %v162_v51, 0.0 }
 0x125   :  { %450 = vmatmul.mubr.f32.vlgmr.msra.gmra.mrb[0].mxu1 %v165_v53 }
 0x1f8   :  { %v255_v58 = vpop.f32.mrb[0].mxu1 }
 0x1f9   :  { %v256_v59 = vadd.f32 %v374_v57, %v255_v58  ;;  %v451_v60 = vpop.f32.mrb[1].mxu1 }
 0x1fb   :  { %v259_v61 = vmax.f32 %v256_v59, 0.0 }
 0x1fd   :  { %485 = vmatmul.mubr.f32.vlgmr.msra.gmra.mrb[2].mxu0 %v259_v61 }
 0x2d0   :  { %v349_v63 = vpop.f32.mrb[2].mxu0 }
 0x2d1   :  { %v350_v0 = vadd.f32 %v375_v62, %v349_v63  ;;  %v486_v1 = vpop.f32.mrb[3].mxu0 }
 0x2d3   :  { %353 = vst [vmem:[#allocation10] sm:$0x3] %v350_v0 }
 0x2d4   :  { %644 = shalt.err (!%p641_p8)
}
 0x2d5   :  { %s645_s10 = scalar_lea.hbm %s808_s7, 32 }
 0x2d6   :  { %p646_p9 = scmp.ne.s32.totalorder %s808_s7, %s645_s10  ;;  %p649_p10 = scmp.lt.u32.totalorder %s645_s10, %s808_s7 }
 0x2d8   :  { %p651_p11 = pnand %p649_p10, %p646_p9 }
 0x2da   :  { %654 = shalt.err (!%p651_p11)
}
 0x2db   :  { %363 = dma.vmem_to_hbm [thread:$0]  %s361_s30, 32, %s808_s7, [#allocation4]  }
 0x2dc   :  { %661 = dma.done.wait [#allocation4], 32  }
 0x2dd   :  { %662 = vsyncadd [#allocation4], 4294967264 }
 0x2de   :  { %367 = vsyncpa [#allocation3], 1 }
 0x2df   :  { %368 = vsyncpa [#allocation6], 1 }
 0x2e0   :  { %369 = vsyncpa [#allocation9], 1 }
 0x2e1   :  { %370 = vsyncpa [#allocation4], 1 }

</bundles_post_ra>
